<compile_context>
chip_gen: v7x
topology: tpu7x:2x2x1
jax: 0.10.0
libtpu: 0.0.40
codegen_flags: <defaults>
</compile_context>

<pallas_src>
import jax
import jax.numpy as jnp
from jax.experimental import pallas as pl
from jax.experimental.pallas import tpu as pltpu


def _round_up(x, m):
    return (x + m - 1) // m * m


def _default_tile_n():
    """Bigger tiles on 128 MiB-VMEM chips (v5e/v6e), smaller on v7x (64 MiB)."""
    try:
        info = pltpu.get_tpu_info()
        vmem = getattr(info, "vmem_capacity_bytes", 0) or 0
        if vmem >= (100 << 20):
            return 4096
    except Exception:
        pass
    return 1024


def gated_attention_kernel(x_ref, wvu_ref, bvu_ref, ww_ref, bw_ref, out_ref):
    # x_ref:   (TILE_N, L_pad)    activation tile (streamed)
    # wvu_ref: (L_pad, 2*D_pad)   [W_V | 0.5*W_U]  (resident)
    # bvu_ref: (1, 2*D_pad)       [b_V | 0.5*b_U]  (resident)
    # ww_ref:  (K_pad, D_pad)     W_w              (resident)
    # bw_ref:  (K_pad, 1)         b_w              (resident)
    # out_ref: (K_pad, TILE_N)    A^T tile (lane-dense)
    d_pad = ww_ref.shape[1]

    # Fused gate projection: one MXU pass over x for both gates.
    z = jnp.dot(x_ref[...], wvu_ref[...],
                preferred_element_type=jnp.float32) + bvu_ref[...]
    t = jnp.tanh(z)                    # single EUP pass over 2*D_pad lanes
    a_v = t[:, :d_pad]                 # tanh(x W_V + b_V)
    a_u = 0.5 * t[:, d_pad:] + 0.5     # sigmoid(x W_U + b_U) via tanh(z/2)
    gated = a_v * a_u                  # (TILE_N, D_pad)

    # Emit (K_pad, TILE_N) directly: contract on D, MXU absorbs the transpose.
    a_t = jax.lax.dot_general(
        ww_ref[...], gated,
        dimension_numbers=(((1,), (1,)), ((), ())),
        preferred_element_type=jnp.float32)
    out_ref[...] = (a_t + bw_ref[...]).astype(out_ref.dtype)


def attention_gated_forward(x, params, *, tile_n=None,
                            compute_dtype=jnp.float32):
    """x: (N, L).  params: natural-layout weights (see init_params).

    Returns A^T of shape (K, N), matching Attention_Gated.forward.
    Set compute_dtype=jnp.bfloat16 to halve HBM traffic for x / the fused
    gate weight (f32 MXU accumulation is kept either way).
    """
    N, L = x.shape
    D = params["wv"].shape[1]
    K = params["ww"].shape[1]
    f32 = jnp.float32

    # ---- padding / tiling (layout plumbing only) ----
    L_pad = _round_up(L, 128)
    D_pad = _round_up(D, 128)
    K_pad = _round_up(K, 8)

    if tile_n is None:
        tile_n = _default_tile_n()
    tile = _round_up(min(tile_n, _round_up(N, 128)), 128)
    N_pad = _round_up(N, tile)
    grid = (N_pad // tile,)

    # ---- pack parameters (done in the wrapper, once per call) ----
    x_p = jnp.pad(x.astype(compute_dtype), ((0, N_pad - N), (0, L_pad - L)))

    wvu = jnp.zeros((L_pad, 2 * D_pad), f32)
    wvu = wvu.at[:L, :D].set(params["wv"].astype(f32))
    wvu = wvu.at[:L, D_pad:D_pad + D].set(0.5 * params["wu"].astype(f32))
    wvu = wvu.astype(compute_dtype)

    bvu = jnp.zeros((1, 2 * D_pad), f32)
    bvu = bvu.at[:, :D].set(params["bv"].astype(f32))
    bvu = bvu.at[:, D_pad:D_pad + D].set(0.5 * params["bu"].astype(f32))

    ww = jnp.zeros((K_pad, D_pad), f32)
    ww = ww.at[:K, :D].set(params["ww"].astype(f32).T)
    bw = jnp.zeros((K_pad, 1), f32)
    bw = bw.at[:K, 0].set(params["bw"].astype(f32).reshape(-1))

    # ---- explicit scoped-VMEM budget (double buffers + resident weights) ----
    in_bytes = jnp.dtype(compute_dtype).itemsize
    needed = (2 * tile * L_pad * in_bytes            # x, double-buffered
              + 2 * K_pad * tile * 4                 # output, double-buffered
              + 2 * L_pad * 2 * D_pad * in_bytes     # fused gate weight
              + 2 * 2 * D_pad * 4                    # fused gate bias
              + 2 * (K_pad * D_pad + K_pad) * 4      # W_w / b_w
              + 4 * tile * 2 * D_pad * 4)            # in-kernel intermediates
    vmem_limit = int(min(max(needed + (8 << 20), 32 << 20), 48 << 20))

    out_p = pl.pallas_call(
        gated_attention_kernel,
        out_shape=jax.ShapeDtypeStruct((K_pad, N_pad), jnp.float32),
        grid=grid,
        in_specs=[
            pl.BlockSpec((tile, L_pad), lambda i: (i, 0)),        # streamed x
            pl.BlockSpec((L_pad, 2 * D_pad), lambda i: (0, 0)),   # resident
            pl.BlockSpec((1, 2 * D_pad), lambda i: (0, 0)),       # resident
            pl.BlockSpec((K_pad, D_pad), lambda i: (0, 0)),       # resident
            pl.BlockSpec((K_pad, 1), lambda i: (0, 0)),           # resident
        ],
        out_specs=pl.BlockSpec((K_pad, tile), lambda i: (0, i)),
        compiler_params=pltpu.CompilerParams(
            dimension_semantics=("parallel",),  # v7x: 2 TCs split the bag
            vmem_limit_bytes=vmem_limit,
        ),
    )(x_p, wvu, bvu, ww, bw)

    return out_p[:K, :N]


def init_params(key, L, D, K):
    """Deterministic synthetic init (uniform, Kaiming-like scale); natural
    (in, out) layout: wv/wu (L, D), bv/bu (1, D), ww (D, K), bw (1, K)."""
    ks = jax.random.split(key, 6)

    def lin(kw, kb, fan_in, fan_out):
        bound = 1.0 / jnp.sqrt(fan_in)
        w = jax.random.uniform(kw, (fan_in, fan_out), jnp.float32, -bound, bound)
        b = jax.random.uniform(kb, (1, fan_out), jnp.float32, -bound, bound)
        return w, b

    wv, bv = lin(ks[0], ks[1], L, D)
    wu, bu = lin(ks[2], ks[3], L, D)
    ww, bw = lin(ks[4], ks[5], D, K)
    return {"wv": wv, "bv": bv, "wu": wu, "bu": bu, "ww": ww, "bw": bw}


def reference_forward(x, p):
    a_v = jnp.tanh(x @ p["wv"] + p["bv"])
    a_u = jax.nn.sigmoid(x @ p["wu"] + p["bu"])
    a = (a_v * a_u) @ p["ww"] + p["bw"]
    return a.T


if __name__ == "__main__":
    # Small shapes consistent with the module: N instances in a bag, L input
    # features, D gate width, K = n_token attention heads.  Chosen to
    # exercise N/L/D/K padding and a multi-step grid (tile_n=128 -> 2 steps).
    N, L, D, K = 200, 200, 96, 5

    key = jax.random.PRNGKey(0)
    k_x, k_p = jax.random.split(key)
    x = jax.random.normal(k_x, (N, L), dtype=jnp.float32)
    params = init_params(k_p, L, D, K)

    out = attention_gated_forward(x, params, tile_n=128)
    out = jax.block_until_ready(out)

    ref = reference_forward(x, params)
    assert out.shape == (K, N), out.shape
    err = float(jnp.max(jnp.abs(out - ref)))
    assert err < 1e-4, f"max err {err}"

    print("KERNEL_OK")
</pallas_src>

<mosaic_0001>
module attributes {stable_mosaic.version = 11 : i64} {
  func.func @gated_attention_kernel(%arg0: i32, %arg1: memref<128x256xf32, #tpu.memory_space<vmem>>, %arg2: memref<256x256xf32, #tpu.memory_space<vmem>>, %arg3: memref<1x256xf32, #tpu.memory_space<vmem>>, %arg4: memref<8x128xf32, #tpu.memory_space<vmem>>, %arg5: memref<8x1xf32, #tpu.memory_space<vmem>>, %arg6: memref<8x128xf32, #tpu.memory_space<vmem>>) attributes {dimension_semantics = [#tpu.dimension_semantics<parallel>], iteration_bounds = array<i64: 2>, scalar_prefetch = 0 : i64, scratch_operands = 0 : i64, tpu.core_type = #tpu.core_type<tc>, window_params = [{transform_indices = @transform_0, window_bounds = array<i64: 128, 256>}, {pipeline_mode = #tpu.pipeline_mode<synchronous>, transform_indices = @transform_1, window_bounds = array<i64: 256, 256>}, {pipeline_mode = #tpu.pipeline_mode<synchronous>, transform_indices = @transform_2, window_bounds = array<i64: 1, 256>}, {pipeline_mode = #tpu.pipeline_mode<synchronous>, transform_indices = @transform_3, window_bounds = array<i64: 8, 128>}, {pipeline_mode = #tpu.pipeline_mode<synchronous>, transform_indices = @transform_4, window_bounds = array<i64: 8, 1>}, {transform_indices = @transform_5, window_bounds = array<i64: 8, 128>}]} {
    %c0 = arith.constant 0 : index
    %c0_0 = arith.constant 0 : index
    %0 = vector.load %arg1[%c0, %c0_0] : memref<128x256xf32, #tpu.memory_space<vmem>>, vector<128x256xf32>
    %c0_1 = arith.constant 0 : index
    %c0_2 = arith.constant 0 : index
    %1 = vector.load %arg2[%c0_1, %c0_2] : memref<256x256xf32, #tpu.memory_space<vmem>>, vector<256x256xf32>
    %cst = arith.constant dense<0.000000e+00> : vector<128x256xf32>
    %2 = tpu.matmul %0, %1, %cst {dimension_numbers = #tpu.dot_dimension_numbers<[1], [0], [0], [1], [0, 0, 1, 1], [], []>} : vector<128x256xf32>, vector<256x256xf32>, vector<128x256xf32> -> vector<128x256xf32>
    %c0_3 = arith.constant 0 : index
    %c0_4 = arith.constant 0 : index
    %3 = vector.load %arg3[%c0_3, %c0_4] : memref<1x256xf32, #tpu.memory_space<vmem>>, vector<1x256xf32>
    %4 = vector.broadcast %3 : vector<1x256xf32> to vector<128x256xf32>
    %5 = arith.addf %2, %4 : vector<128x256xf32>
    %6 = math.tanh %5 : vector<128x256xf32>
    %7 = vector.extract_strided_slice %6 {offsets = [0, 0], sizes = [128, 128], strides = [1, 1]} : vector<128x256xf32> to vector<128x128xf32>
    %8 = vector.extract_strided_slice %6 {offsets = [0, 128], sizes = [128, 128], strides = [1, 1]} : vector<128x256xf32> to vector<128x128xf32>
    %cst_5 = arith.constant 5.000000e-01 : f32
    %9 = vector.broadcast %cst_5 : f32 to vector<128x128xf32>
    %10 = arith.mulf %9, %8 : vector<128x128xf32>
    %cst_6 = arith.constant 5.000000e-01 : f32
    %11 = vector.broadcast %cst_6 : f32 to vector<128x128xf32>
    %12 = arith.addf %10, %11 : vector<128x128xf32>
    %13 = arith.mulf %7, %12 : vector<128x128xf32>
    %c0_7 = arith.constant 0 : index
    %c0_8 = arith.constant 0 : index
    %14 = vector.load %arg4[%c0_7, %c0_8] : memref<8x128xf32, #tpu.memory_space<vmem>>, vector<8x128xf32>
    %cst_9 = arith.constant dense<0.000000e+00> : vector<8x128xf32>
    %15 = tpu.matmul %14, %13, %cst_9 {dimension_numbers = #tpu.dot_dimension_numbers<[1], [1], [0], [0], [0, 0, 1, 0], [], []>} : vector<8x128xf32>, vector<128x128xf32>, vector<8x128xf32> -> vector<8x128xf32>
    %c0_10 = arith.constant 0 : index
    %c0_11 = arith.constant 0 : index
    %16 = vector.load %arg5[%c0_10, %c0_11] : memref<8x1xf32, #tpu.memory_space<vmem>>, vector<8x1xf32>
    %17 = vector.broadcast %16 : vector<8x1xf32> to vector<8x128xf32>
    %18 = arith.addf %15, %17 : vector<8x128xf32>
    %c0_12 = arith.constant 0 : index
    %c0_13 = arith.constant 0 : index
    %19 = vector.load %arg6[%c0_12, %c0_13] : memref<8x128xf32, #tpu.memory_space<vmem>>, vector<8x128xf32>
    tpu.vector_store %arg6[%c0_12, %c0_13], %18 {strides = array<i32>} : memref<8x128xf32, #tpu.memory_space<vmem>>, vector<8x128xf32>,
    return
  }
  func.func @transform_0(%arg0: i32) -> (i32, i32) {
    %c0_i32 = arith.constant 0 : i32
    %c0_i32_0 = arith.constant 0 : i32
    return %arg0, %c0_i32 : i32, i32
  }
  func.func @transform_1(%arg0: i32) -> (i32, i32) {
    %c0_i32 = arith.constant 0 : i32
    %c0_i32_0 = arith.constant 0 : i32
    %c0_i32_1 = arith.constant 0 : i32
    return %c0_i32, %c0_i32_0 : i32, i32
  }
  func.func @transform_2(%arg0: i32) -> (i32, i32) {
    %c0_i32 = arith.constant 0 : i32
    %c0_i32_0 = arith.constant 0 : i32
    %c0_i32_1 = arith.constant 0 : i32
    return %c0_i32, %c0_i32_0 : i32, i32
  }
  func.func @transform_3(%arg0: i32) -> (i32, i32) {
    %c0_i32 = arith.constant 0 : i32
    %c0_i32_0 = arith.constant 0 : i32
    %c0_i32_1 = arith.constant 0 : i32
    return %c0_i32, %c0_i32_0 : i32, i32
  }
  func.func @transform_4(%arg0: i32) -> (i32, i32) {
    %c0_i32 = arith.constant 0 : i32
    %c0_i32_0 = arith.constant 0 : i32
    %c0_i32_1 = arith.constant 0 : i32
    return %c0_i32, %c0_i32_0 : i32, i32
  }
  func.func @transform_5(%arg0: i32) -> (i32, i32) {
    %c0_i32 = arith.constant 0 : i32
    %c0_i32_0 = arith.constant 0 : i32
    return %c0_i32, %arg0 : i32, i32
  }
}

</mosaic_0001>

<bundles_post_ra>
// kernel: tpu_custom_call.1
= control target key start
LH: loop header
LB: loop body
LE: loop exit
PB: predicated region body
PF: predicated region fallthrough
CT: control target
= control target key end

     0   :  { %10 = vsyncpa [#allocation3], 0  ;;  %s1529_s0 = inlined_call_operand.hbm [shape: f32[256,256], index: 0, kind: input, shape index: {}]   ;;  %s1530_s1 = inlined_call_operand.hbm [shape: f32[256,256], index: 1, kind: input, shape index: {}]   ;;  %s1531_s2 = inlined_call_operand.vmem [shape: f32[1,256], index: 2, kind: input, shape index: {}]   ;;  %s1532_s3 = inlined_call_operand.vmem [shape: f32[8,128], index: 3, kind: input, shape index: {}]   ;;  %s1533_s4 = inlined_call_operand.vmem [shape: f32[8,1], index: 4, kind: input, shape index: {}]   ;;  %s1534_s5 = inlined_call_operand.hbm [shape: f32[8,256], index: 5, kind: output, shape index: {}]  }
   0x1   :  { %12 = vsyncpa [#allocation3 + $0x1], 0 }
   0x2   :  { %13 = vsyncpa [#allocation6], 0 }
   0x3   :  { %14 = vsyncpa [#allocation4], 0 }
   0x4   :  { %16 = vsyncpa [#allocation4 + $0x1], 0  ;;  %s1236_s18 = smov 0   ;;  %s1238_s19 = smov 0  }
   0x5   :  { %s1240_s20 = smov 0   ;;  %s1242_s21 = smov 0  }
   0x6 LB: > { %s1257_s22 = sadd.s32 4294967295, %s1195_s21   ;;  %s781_s23 = sadd.s32 4294967294, %s1195_s21   ;;  %s1195_s21 = sphi %s1242_s21, %s1554_s21   ;;  %s1191_s20 = sphi %s1240_s20, %s1553_s20   ;;  %s1187_s19 = sphi %s1238_s19, %s1552_s19   ;;  %s1183_s18 = sphi %s1236_s18, %s1551_s18  }
   0x7   : > { %p42_p0 = scmp.ne.s32.totalorder %s1187_s19, %s1183_s18  ;;  %p1535_p1 = scmp.eq.s32.totalorder %s1257_s22, 0 }
   0x8   : > { %p156_p3 = scmp.eq.s32.totalorder %s781_s23, 1  ;;  %p782_p5 = scmp.ge.s32.totalorder %s1195_s21, 1 }
   0x9   : > { %p1266_p4 = por %p1535_p1, %p42_p0  ;;  %p163_p7 = scmp.lt.s32.totalorder %s1195_s21, 3 }
   0xa   : > { %p1271_p6 = por %p156_p3, %p42_p0  ;;  %s1197_s27 = smov [#allocation5]  }
   0xb   : > { %s1538_s24 = scalar_select %p1266_p4, 1, 0 }
   0xc   : > { %s1539_s25 = scalar_select %p1271_p6, 1, 0 }
   0xd   : > { %p1276_p8 = pnand %p782_p5, %p163_p7  ;;  %s175_s28 = sshll.u32 %s1197_s27, 4  ;;  %s1280_s28 = int_to_ptr.vmem [resolvable:$true] %s175_s28 }
   0xe   : > { %s1292_s30 = sadd.s32 1, %s1195_s21   ;;  %s29_s6 = sadd.s32 1, %s1191_s20 }
   0xf   : > { %s1540_s26 = scalar_select %p1276_p8, 1, 0 }
  0x10   : > { %p947_p9 = pneg %p1276_p8  ;;  %s26_s7 = ssub.s32 %s1195_s21, %s1292_s30 }
  0x11   : > { %s1067_s10 = scalar_lea.hbm %s1530_s1, 8192 }
  0x12   : > { %p1287_p11 = pnand %p947_p9, %p1535_p1  ;;  %p1068_p12 = scmp.ne.s32.totalorder %s1530_s1, %s1067_s10 }
  0x13   : > { %p1074_p5 = scmp.lt.u32.totalorder %s1067_s10, %s1530_s1 }
  0x14   : > { %p1069_p13 = pneg %p1287_p11 }
  0x16   : > { %p1070_p0 = pnand %p1069_p13, %p1068_p12 }
  0x18   : > { %p1071_p3 = pneg %p1070_p0 }
  0x1a   : > { %p1076_p7 = pnand %p1074_p5, %p1071_p3 }
  0x1c   : > { %1079 = shalt.err (!%p1076_p7)
}
  0x1d   : > { %s1080_s15 = scalar_lea.vmem %s1280_s28, 8192  ;;  %p1088_p2 = scmp.lt.s32.totalorder %s1280_s28, %s1280_s28 }
  0x1e   : > { %p1081_p9 = scmp.ne.s32.totalorder %s1280_s28, %s1080_s15  ;;  %p1089_p6 = scmp.lt.s32.totalorder %s1080_s15, %s1080_s15 }
  0x20   : > { %p1083_p10 = pnand %p1081_p9, %p1069_p13  ;;  %p1090_p4 = por %p1089_p6, %p1088_p2 }
  0x22   : > { %p1084_p1 = pneg %p1083_p10 }
  0x24   : > { %p1091_p8 = pnand %p1090_p4, %p1084_p1 }
  0x26   : > { %1094 = shalt.err (!%p1091_p8)
}
  0x27   : > { %s1198_s16 = smov 256   ;;  %s1199_s17 = smov 16  }
  0x28   : > { %950 = dma.hbm_to_vmem [thread:$0]  (!%p1287_p11), %s1530_s1, 8192, %s1280_s28, [#allocation6], %s1198_s16, %s1198_s16, %s1199_s17  }
  0x29   : > { %p27_p1 = scmp.eq.s32.totalorder %s26_s7, 0  ;;  %p36_p2 = scmp.ne.s32.totalorder %s1191_s20, %s1187_s19 }
  0x2a   : > { %p37_p4 = scmp.eq.s32.totalorder %s1195_s21, 0  ;;  %p960_p6 = scmp.lt.s32.totalorder %s1195_s21, 2 }
  0x2b   : > { %s1326_s8 = scalar_select %p27_p1, %s1191_s20, %s29_s6  }
  0x2c   : > { %p38_p8 = por %p37_p4, %p36_p2  ;;  %p1542_p10 = scmp.eq.s32.totalorder %s1257_s22, 1 }
  0x2d   : > { %s198_s29 = sand.u32 1, %s1191_s20   ;;  %s798_s10 = sshll.u32 %s1195_s21, 12 }
  0x2e   : > { %p1330_p12 = por %p1542_p10, %p36_p2  ;;  %s785_s11 = sshll.u32 %s198_s29, 8 }
  0x2f   : > { %s1339_s14 = scalar_lea.hbm %s1529_s0, %s798_s10  ;;  %s202_s28 = scalar_lea.vmem [#allocation2], %s785_s11 }
  0x30   : > { %s210_s6 = sshll.u32 %s202_s28, 4  ;;  %p1341_p11 = pnand %p960_p6, %p38_p8  ;;  %s1345_s6 = int_to_ptr.vmem [resolvable:$true] %s210_s6 }
  0x31   : > { %s1347_s15 = scalar_lea.sflag [#allocation3], %s198_s29  ;;  %s1095_s23 = scalar_lea.hbm %s1339_s14, 4096 }
  0x32   : > { %p1096_p13 = scmp.ne.s32.totalorder %s1339_s14, %s1095_s23  ;;  %p1097_p0 = pneg %p1341_p11 }
  0x33   : > { %s1100_s11 = scalar_lea.hbm %s1529_s0, 8192  ;;  %p1101_p7 = scmp.lt.u32.totalorder %s1339_s14, %s1529_s0 }
  0x34   : > { %p1098_p3 = pnand %p1097_p0, %p1096_p13  ;;  %p1102_p9 = scmp.lt.u32.totalorder %s1100_s11, %s1095_s23 }
  0x35   : > { %p1104_p2 = scmp.lt.u32.totalorder %s1095_s23, %s1339_s14 }
  0x36   : > { %p1099_p5 = pneg %p1098_p3  ;;  %p1103_p1 = por %p1102_p9, %p1101_p7 }
  0x38   : > { %p1105_p4 = por %p1104_p2, %p1103_p1 }
  0x3a   : > { %p1106_p6 = pnand %p1105_p4, %p1099_p5 }
  0x3c   : > { %1109 = shalt.err (!%p1106_p6)
}
  0x3d   : > { %s1110_s29 = scalar_lea.vmem %s1345_s6, 4096  ;;  %s1200_s28 = smov [#allocation2]  }
  0x3e   : > { %p1111_p8 = scmp.ne.s32.totalorder %s1345_s6, %s1110_s29  ;;  %s1115_s27 = sshll.u32 %s1200_s28, 4  ;;  %s1116_s27 = int_to_ptr.vmem [resolvable:$false] %s1115_s27 }
  0x3f   : > { %s1117_s10 = scalar_lea.vmem %s1116_s27, 8192  ;;  %p1118_p3 = scmp.lt.s32.totalorder %s1345_s6, %s1116_s27 }
  0x40   : > { %p1113_p10 = pnand %p1111_p8, %p1097_p0  ;;  %p1119_p7 = scmp.lt.s32.totalorder %s1117_s10, %s1110_s29 }
  0x42   : > { %p1114_p13 = pneg %p1113_p10  ;;  %p1120_p9 = por %p1119_p7, %p1118_p3 }
  0x44   : > { %p1121_p1 = pnand %p1120_p9, %p1114_p13 }
  0x46   : > { %1124 = shalt.err (!%p1121_p1)
}
  0x47   : > { %954 = dma.hbm_to_vmem [thread:$0]  (!%p1341_p11), %s1339_s14, 4096, %s1345_s6, %s1347_s15, %s1198_s16, %s1198_s16, %s1199_s17  }
  0x48   : > { %p1545_p0 = scmp.ne.s32.totalorder %s1540_s26, 0 }
  0x49   : > { %s1381_s23 = sand.u32 (!%p1545_p0), 1, %s1187_s19   ;;  %p1546_p5 = scmp.ne.s32.totalorder (!%p1545_p0), %s1538_s24, 0 }
  0x4a   : > { %222 = sbr.rel (%p1545_p0) target bundleno = 681 (0x2a9), region = 40  ;;  %s790_s11 = sshll.u32 (!%p1545_p0), %s1381_s23, 8 }
  0x4b   : > { %s225_s12 = scalar_lea.sflag (!%p1545_p0), [#allocation3], %s1381_s23  ;;  %s1385_s13 = scalar_lea.vmem (!%p1545_p0), [#allocation2], %s790_s11 }
  0x51   : > { %1170 = dma.done.wait (%p1546_p5), %s225_s12, 4096  }
  0x52   : > { %1172 = vsyncadd (%p1546_p5), %s225_s12, 4294963200  ;;  %p1547_p11 = scmp.eq.s32.totalorder %s1257_s22, 0 }
  0x54   : > { %1174 = dma.done.wait (%p1547_p11), [#allocation6], 8192   ;;  %p1548_p2 = pmov %p1547_p11 }
  0x55   : > { %v293_v0 = vld [vmem:[#allocation5 + $0x8] sm:$0xff]  ;;  %v295_v1 = vld [vmem:[#allocation5 + $0x18] sm:$0xff]  ;;  %v292_v2 = vld [vmem:[#allocation5] sm:$0xff]  ;;  %vm1202_vm0 = vmmov 0   ;;  %s792_s7 = sshll.u32 %s1381_s23, 3  ;;  %s794_s15 = sshll.u32 %s1257_s22, 7 }
  0x56   : > { %1176 = vsyncadd (%p1548_p2), [#allocation6], 4294959104  ;;  %v851_v3 = vpack.c.bf16 %v295_v1, %v293_v0  ;;  %v294_v4 = vld [vmem:[#allocation5 + $0x10] sm:$0xff]  ;;  %v297_v5 = vld [vmem:[#allocation5 + $0x28] sm:$0xff]  ;;  %s258_s29 = scalar_lea.vmem [#allocation7], %s792_s7  ;;  %s1485_s11 = scalar_lea.hbm %s1534_s5, %s794_s15 }
  0x57   : > { %v299_v6 = vld [vmem:[#allocation5 + $0x38] sm:$0xff]  ;;  %v853_v7 = vpack.c.bf16 %v294_v4, %v292_v2  ;;  %v296_v9 = vld [vmem:[#allocation5 + $0x20] sm:$0xff]  ;;  %v298_v10 = vld [vmem:[#allocation5 + $0x30] sm:$0xff]  ;;  %s701_s28 = sshll.u32 %s258_s29, 4  ;;  %s688_s12 = scalar_lea.sflag [#allocation4], %s1381_s23  ;;  %s1487_s28 = int_to_ptr.vmem [resolvable:$true] %s701_s28 }
  0x58   : > { %v855_v8 = vpack.c.bf16 %v299_v6, %v297_v5  ;;  %v301_v11 = vld [vmem:[#allocation5 + $0x48] sm:$0xff]  ;;  %852 = vmatprep.subr.bf16.mxu0 %v851_v3  ;;  %v303_v12 = vld [vmem:[#allocation5 + $0x58] sm:$0xff]  ;;  %v857_v13 = vpack.c.bf16 %v298_v10, %v296_v9  ;;  %v300_v15 = vld [vmem:[#allocation5 + $0x40] sm:$0xff]  ;;  %s1205_s22 = smov [#allocation7]  }
  0x59   : > { %854 = vmatpush1.bf16.msra.mxu0 %v853_v7  ;;  %v859_v14 = vpack.c.bf16 %v303_v12, %v301_v11  ;;  %v302_v16 = vld [vmem:[#allocation5 + $0x50] sm:$0xff]  ;;  %v305_v17 = vld [vmem:[#allocation5 + $0x68] sm:$0xff]  ;;  %v307_v18 = vld [vmem:[#allocation5 + $0x78] sm:$0xff]  ;;  %s1129_s24 = sshll.u32 %s1205_s22, 4  ;;  %s1130_s24 = int_to_ptr.vmem [resolvable:$false] %s1129_s24 }
  0x5a   : > { %856 = vmatprep.subr.bf16.mxu0 %v855_v8  ;;  %v861_v19 = vpack.c.bf16 %v302_v16, %v300_v15  ;;  %v863_v20 = vpack.c.bf16 %v307_v18, %v305_v17  ;;  %v304_v21 = vld [vmem:[#allocation5 + $0x60] sm:$0xff]  ;;  %v306_v22 = vld [vmem:[#allocation5 + $0x70] sm:$0xff]  ;;  %v309_v23 = vld [vmem:[#allocation5 + $0x88] sm:$0xff]  ;;  %s1131_s26 = scalar_lea.vmem %s1130_s24, 256  ;;  %p1132_p10 = scmp.lt.s32.totalorder %s1487_s28, %s1130_s24 }
  0x5b   : > { %v311_v24 = vld [vmem:[#allocation5 + $0x98] sm:$0xff]  ;;  %v865_v25 = vpack.c.bf16 %v306_v22, %v304_v21  ;;  %v308_v27 = vld [vmem:[#allocation5 + $0x80] sm:$0xff]  ;;  %v310_v28 = vld [vmem:[#allocation5 + $0x90] sm:$0xff] }
  0x5c   : > { %v867_v26 = vpack.c.bf16 %v311_v24, %v309_v23  ;;  %v313_v29 = vld [vmem:[#allocation5 + $0xa8] sm:$0xff]  ;;  %v315_v30 = vld [vmem:[#allocation5 + $0xb8] sm:$0xff]  ;;  %v869_v31 = vpack.c.bf16 %v310_v28, %v308_v27  ;;  %v312_v33 = vld [vmem:[#allocation5 + $0xa0] sm:$0xff] }
  0x5d   : > { %858 = vmatpush1.bf16.msra.mxu0 %v857_v13  ;;  %v871_v32 = vpack.c.bf16 %v315_v30, %v313_v29  ;;  %v314_v34 = vld [vmem:[#allocation5 + $0xb0] sm:$0xff]  ;;  %v317_v35 = vld [vmem:[#allocation5 + $0xc8] sm:$0xff]  ;;  %v319_v36 = vld [vmem:[#allocation5 + $0xd8] sm:$0xff] }
  0x5e   : > { %860 = vmatprep.subr.bf16.mxu0 %v859_v14  ;;  %v873_v37 = vpack.c.bf16 %v314_v34, %v312_v33  ;;  %v875_v38 = vpack.c.bf16 %v319_v36, %v317_v35  ;;  %v316_v39 = vld [vmem:[#allocation5 + $0xc0] sm:$0xff]  ;;  %v318_v40 = vld [vmem:[#allocation5 + $0xd0] sm:$0xff]  ;;  %v261_v41 = vld [vmem:[%s1385_s13 + $0x8] sm:$0xff] }
  0x5f   : > { %v321_v42 = vld [vmem:[#allocation5 + $0xe8] sm:$0xff]  ;;  %v323_v43 = vld [vmem:[#allocation5 + $0xf8] sm:$0xff]  ;;  %432 = vmatprep.mubr.f32.mxu0 %v261_v41  ;;  %v877_v44 = vpack.c.bf16 %v318_v40, %v316_v39  ;;  %v320_v46 = vld [vmem:[#allocation5 + $0xe0] sm:$0xff] }
  0x60   : > { %v879_v45 = vpack.c.bf16 %v323_v43, %v321_v42  ;;  %v322_v47 = vld [vmem:[#allocation5 + $0xf0] sm:$0xff]  ;;  %v325_v48 = vld [vmem:[#allocation5 + $0x108] sm:$0xff]  ;;  %v327_v49 = vld [vmem:[#allocation5 + $0x118] sm:$0xff] }
  0x61   : > { %862 = vmatpush1.bf16.msra.mxu0 %v861_v19  ;;  %v881_v50 = vpack.c.bf16 %v322_v47, %v320_v46  ;;  %v883_v51 = vpack.c.bf16 %v327_v49, %v325_v48  ;;  %v324_v52 = vld [vmem:[#allocation5 + $0x100] sm:$0xff]  ;;  %v326_v53 = vld [vmem:[#allocation5 + $0x110] sm:$0xff]  ;;  %v329_v54 = vld [vmem:[#allocation5 + $0x128] sm:$0xff] }
  0x62   : > { %864 = vmatprep.subr.bf16.mxu0 %v863_v20  ;;  %v331_v55 = vld [vmem:[#allocation5 + $0x138] sm:$0xff]  ;;  %v885_v56 = vpack.c.bf16 %v326_v53, %v324_v52  ;;  %v328_v58 = vld [vmem:[#allocation5 + $0x120] sm:$0xff]  ;;  %v330_v59 = vld [vmem:[#allocation5 + $0x130] sm:$0xff] }
  0x63   : > { %v887_v57 = vpack.c.bf16 %v331_v55, %v329_v54  ;;  %v333_v60 = vld [vmem:[#allocation5 + $0x148] sm:$0xff]  ;;  %v335_v61 = vld [vmem:[#allocation5 + $0x158] sm:$0xff]  ;;  %v889_v62 = vpack.c.bf16 %v330_v59, %v328_v58  ;;  %v332_v0 = vld [vmem:[#allocation5 + $0x140] sm:$0xff] }
  0x64   : > { %v891_v63 = vpack.c.bf16 %v335_v61, %v333_v60  ;;  %v334_v1 = vld [vmem:[#allocation5 + $0x150] sm:$0xff]  ;;  %v337_v2 = vld [vmem:[#allocation5 + $0x168] sm:$0xff]  ;;  %v339_v3 = vld [vmem:[#allocation5 + $0x178] sm:$0xff] }
  0x65   : > { %866 = vmatpush1.bf16.msra.mxu0 %v865_v25  ;;  %v893_v4 = vpack.c.bf16 %v334_v1, %v332_v0  ;;  %v895_v5 = vpack.c.bf16 %v339_v3, %v337_v2  ;;  %v336_v6 = vld [vmem:[#allocation5 + $0x160] sm:$0xff]  ;;  %v338_v7 = vld [vmem:[#allocation5 + $0x170] sm:$0xff]  ;;  %v341_v8 = vld [vmem:[#allocation5 + $0x188] sm:$0xff]  ;;  %v1201_v0 = vmov 0.0|0.0   ;;  %v1203_v1 = vmov 0.0  }
  0x66   : > { %868 = vmatprep.subr.bf16.mxu0 %v867_v26  ;;  %v343_v9 = vld [vmem:[#allocation5 + $0x198] sm:$0xff]  ;;  %v897_v10 = vpack.c.bf16 %v338_v7, %v336_v6  ;;  %v340_v12 = vld [vmem:[#allocation5 + $0x180] sm:$0xff]  ;;  %v342_v13 = vld [vmem:[#allocation5 + $0x190] sm:$0xff]  ;;  %915 = vmatprep.subr.bf16.mxu1 %v1201_v0  ;;  %v1204_v3 = vmov 0  }
  0x67   : > { %v899_v11 = vpack.c.bf16 %v343_v9, %v341_v8  ;;  %v345_v14 = vld [vmem:[#allocation5 + $0x1a8] sm:$0xff]  ;;  %v347_v15 = vld [vmem:[#allocation5 + $0x1b8] sm:$0xff]  ;;  %v901_v16 = vpack.c.bf16 %v342_v13, %v340_v12  ;;  %v344_v18 = vld [vmem:[#allocation5 + $0x1a0] sm:$0xff]  ;;  %848 = vmatprep.mubr.msk.f32.mxu1 %vm1202_vm0, %v1203_v1  ;;  %1002 = vset.pattern.permute.xlu0 %v1204_v3 }
  0x68   : > { %v903_v17 = vpack.c.bf16 %v347_v15, %v345_v14  ;;  %v346_v19 = vld [vmem:[#allocation5 + $0x1b0] sm:$0xff]  ;;  %v349_v20 = vld [vmem:[#allocation5 + $0x1c8] sm:$0xff]  ;;  %v351_v21 = vld [vmem:[#allocation5 + $0x1d8] sm:$0xff] }
  0x69   : > { %870 = vmatpush1.bf16.msra.mxu0 %v869_v31  ;;  %v905_v22 = vpack.c.bf16 %v346_v19, %v344_v18  ;;  %v907_v23 = vpack.c.bf16 %v351_v21, %v349_v20  ;;  %v348_v24 = vld [vmem:[#allocation5 + $0x1c0] sm:$0xff]  ;;  %v350_v25 = vld [vmem:[#allocation5 + $0x1d0] sm:$0xff]  ;;  %v353_v26 = vld [vmem:[#allocation5 + $0x1e8] sm:$0xff] }
  0x6a   : > { %872 = vmatprep.subr.bf16.mxu0 %v871_v32  ;;  %v355_v27 = vld [vmem:[#allocation5 + $0x1f8] sm:$0xff]  ;;  %v909_v28 = vpack.c.bf16 %v350_v25, %v348_v24  ;;  %v352_v30 = vld [vmem:[#allocation5 + $0x1e0] sm:$0xff]  ;;  %v354_v31 = vld [vmem:[#allocation5 + $0x1f0] sm:$0xff] }
  0x6b   : > { %v911_v29 = vpack.c.bf16 %v355_v27, %v353_v26  ;;  %v913_v32 = vpack.c.bf16 %v354_v31, %v352_v30  ;;  %v260_v33 = vld [vmem:[%s1385_s13] sm:$0xff]  ;;  %v263_v34 = vld [vmem:[%s1385_s13 + $0x18] sm:$0xff]  ;;  %v262_v35 = vld [vmem:[%s1385_s13 + $0x10] sm:$0xff] }
  0x6c   : > { %v265_v36 = vld [vmem:[%s1385_s13 + $0x28] sm:$0xff]  ;;  %v266_v39 = vld [vmem:[%s1385_s13 + $0x30] sm:$0xff]  ;;  %v268_v41 = vld [vmem:[%s1385_s13 + $0x40] sm:$0xff] }
  0x6d   : > { %874 = vmatpush1.bf16.msra.mxu0 %v873_v37  ;;  %v264_v37 = vld [vmem:[%s1385_s13 + $0x20] sm:$0xff]  ;;  %v269_v40 = vld [vmem:[%s1385_s13 + $0x48] sm:$0xff]  ;;  %v271_v42 = vld [vmem:[%s1385_s13 + $0x58] sm:$0xff] }
  0x6e   : > { %876 = vmatprep.subr.bf16.mxu0 %v875_v38  ;;  %v267_v38 = vld [vmem:[%s1385_s13 + $0x38] sm:$0xff]  ;;  %v270_v43 = vld [vmem:[%s1385_s13 + $0x50] sm:$0xff]  ;;  %v277_v48 = vld [vmem:[%s1385_s13 + $0x88] sm:$0xff] }
  0x6f   : > { %v275_v46 = vld [vmem:[%s1385_s13 + $0x78] sm:$0xff]  ;;  %v274_v47 = vld [vmem:[%s1385_s13 + $0x70] sm:$0xff]  ;;  %v276_v49 = vld [vmem:[%s1385_s13 + $0x80] sm:$0xff] }
  0x70   : > { %v281_v52 = vld [vmem:[%s1385_s13 + $0xa8] sm:$0xff]  ;;  %v280_v53 = vld [vmem:[%s1385_s13 + $0xa0] sm:$0xff]  ;;  %v283_v54 = vld [vmem:[%s1385_s13 + $0xb8] sm:$0xff] }
  0x71   : > { %878 = vmatpush1.bf16.msra.mxu0 %v877_v44  ;;  %v273_v44 = vld [vmem:[%s1385_s13 + $0x68] sm:$0xff]  ;;  %v282_v55 = vld [vmem:[%s1385_s13 + $0xb0] sm:$0xff]  ;;  %v287_v58 = vld [vmem:[%s1385_s13 + $0xd8] sm:$0xff] }
  0x72   : > { %880 = vmatprep.subr.bf16.mxu0 %v879_v45  ;;  %v272_v45 = vld [vmem:[%s1385_s13 + $0x60] sm:$0xff]  ;;  %v286_v59 = vld [vmem:[%s1385_s13 + $0xd0] sm:$0xff]  ;;  %v289_v60 = vld [vmem:[%s1385_s13 + $0xe8] sm:$0xff] }
  0x73   : > { %v288_v61 = vld [vmem:[%s1385_s13 + $0xe0] sm:$0xff] }
  0x74   : > { %v610_v2 = vld [vmem:[%s1533_s4] sm:$0xff] }
  0x75   : > { %882 = vmatpush1.bf16.msra.mxu0 %v881_v50  ;;  %v279_v50 = vld [vmem:[%s1385_s13 + $0x98] sm:$0xff]  ;;  %613 = vperm.xlu0 %1002, %v610_v2   ;;  %v356_v7 = vld [vmem:[%s1531_s2] sm:$0x3] }
  0x76   : > { %884 = vmatprep.subr.bf16.mxu0 %v883_v51  ;;  %v278_v51 = vld [vmem:[%s1385_s13 + $0x90] sm:$0xff] }
  0x79   : > { %886 = vmatpush1.bf16.msra.mxu0 %v885_v56  ;;  %v285_v56 = vld [vmem:[%s1385_s13 + $0xc8] sm:$0xff] }
  0x7a   : > { %888 = vmatprep.subr.bf16.mxu0 %v887_v57  ;;  %v284_v57 = vld [vmem:[%s1385_s13 + $0xc0] sm:$0xff] }
  0x7d   : > { %890 = vmatpush1.bf16.msra.mxu0 %v889_v62  ;;  %v291_v62 = vld [vmem:[%s1385_s13 + $0xf8] sm:$0xff] }
  0x7e   : > { %892 = vmatprep.subr.bf16.mxu0 %v891_v63  ;;  %v290_v63 = vld [vmem:[%s1385_s13 + $0xf0] sm:$0xff]  ;;  %s1125_s13 = scalar_lea.vmem %s1487_s28, 128 }
  0x7f   : > { %p1126_p4 = scmp.ne.s32.totalorder %s1487_s28, %s1125_s13  ;;  %p1133_p13 = scmp.lt.s32.totalorder %s1131_s26, %s1125_s13 }
  0x81   : > { %894 = vmatpush1.bf16.msra.mxu0 %v893_v4  ;;  %v358_v4 = vlaneseq  ;;  %p1127_p6 = pnand %p1126_p4, %p1330_p12  ;;  %p1134_p3 = por %p1133_p13, %p1132_p10 }
  0x82   : > { %896 = vmatprep.subr.bf16.mxu0 %v895_v5 }
  0x83   : > { %v359_v5 = vshrl.u32 %v358_v4, 7  ;;  %p1128_p8 = pneg %p1127_p6 }
  0x85   : > { %898 = vmatpush1.bf16.msra.mxu0 %v897_v10  ;;  %v364_v6 = vsub.s32 1, %v359_v5  ;;  %v360_v8 = vsub.s32 0, %v359_v5  ;;  %p1135_p7 = pnand %p1134_p3, %p1128_p8 }
  0x86   : > { %900 = vmatprep.subr.bf16.mxu0 %v899_v11 }
  0x87   : > { %v1434_v9 = vrot.slane %v356_v7, %v364_v6  ;;  %v1436_v10 = vrot.slane %v356_v7, %v360_v8 }
  0x89   : > { %902 = vmatpush1.bf16.msra.mxu0 %v901_v16 }
  0x8a   : > { %904 = vmatprep.subr.bf16.mxu0 %v903_v17 }
  0x8d   : > { %906 = vmatpush1.bf16.msra.mxu0 %v905_v22 }
  0x8e   : > { %908 = vmatprep.subr.bf16.mxu0 %v907_v23 }
  0x91   : > { %910 = vmatpush1.bf16.msra.mxu0 %v909_v28 }
  0x92   : > { %912 = vmatprep.subr.bf16.mxu0 %v911_v29 }
  0x95   : > { %914 = vmatpush1.bf16.msra.mxu0 %v913_v32 }
  0x98   : > { %433 = vmatmul.mubr.f32.vlgmr.msra.gmra.mrb[0].mxu0 %v260_v33 }
  0x99   : > { %438 = vmatprep.mubr.f32.mxu0 %v263_v34 }
  0x9c   : > { %439 = vmatmul.mubr.f32.gmra.mrb[2].mxu0 %v262_v35 }
  0x9d   : > { %444 = vmatprep.mubr.f32.mxu0 %v265_v36 }
  0xa0   : > { %445 = vmatmul.mubr.f32.gmra.mrb[4].mxu0 %v264_v37 }
  0xa1   : > { %450 = vmatprep.mubr.f32.mxu0 %v267_v38 }
  0xa4   : > { %451 = vmatmul.mubr.f32.gmra.mrb[6].mxu0 %v266_v39 }
  0xa5   : > { %456 = vmatprep.mubr.f32.mxu0 %v269_v40 }
  0xa8   : > { %457 = vmatmul.mubr.f32.gmra.mrb[8].mxu0 %v268_v41 }
  0xa9   : > { %462 = vmatprep.mubr.f32.mxu0 %v271_v42 }
  0xac   : > { %463 = vmatmul.mubr.f32.gmra.mrb[10].mxu0 %v270_v43 }
  0xad   : > { %468 = vmatprep.mubr.f32.mxu0 %v273_v44 }
  0xb0   : > { %469 = vmatmul.mubr.f32.gmra.mrb[12].mxu0 %v272_v45 }
  0xb1   : > { %474 = vmatprep.mubr.f32.mxu0 %v275_v46 }
  0xb4   : > { %475 = vmatmul.mubr.f32.gmra.mrb[14].mxu0 %v274_v47 }
  0xb5   : > { %480 = vmatprep.mubr.f32.mxu0 %v277_v48 }
  0xb8   : > { %481 = vmatmul.mubr.f32.gmra.mrb[16].mxu0 %v276_v49 }
  0xb9   : > { %486 = vmatprep.mubr.f32.mxu0 %v279_v50 }
  0xbc   : > { %487 = vmatmul.mubr.f32.gmra.mrb[18].mxu0 %v278_v51 }
  0xbd   : > { %492 = vmatprep.mubr.f32.mxu0 %v281_v52 }
  0xc0   : > { %493 = vmatmul.mubr.f32.gmra.mrb[20].mxu0 %v280_v53 }
  0xc1   : > { %498 = vmatprep.mubr.f32.mxu0 %v283_v54 }
  0xc4   : > { %499 = vmatmul.mubr.f32.gmra.mrb[22].mxu0 %v282_v55 }
  0xc5   : > { %504 = vmatprep.mubr.f32.mxu0 %v285_v56 }
  0xc8   : > { %505 = vmatmul.mubr.f32.gmra.mrb[24].mxu0 %v284_v57 }
  0xc9   : > { %510 = vmatprep.mubr.f32.mxu0 %v287_v58 }
  0xcc   : > { %511 = vmatmul.mubr.f32.gmra.mrb[26].mxu0 %v286_v59 }
  0xcd   : > { %516 = vmatprep.mubr.f32.mxu0 %v289_v60 }
  0xd0   : > { %517 = vmatmul.mubr.f32.gmra.mrb[28].mxu0 %v288_v61 }
  0xd1   : > { %522 = vmatprep.mubr.f32.mxu0 %v291_v62 }
  0xd4   : > { %523 = vmatmul.mubr.f32.gmra.mrb[30].mxu0 %v290_v63 }
 0x16b   : > { %v434_v11 = vpop.f32.mrb[0].mxu0 }
 0x16c   : > { %v436_v12 = vpop.f32.mrb[1].mxu0  ;;  %v435_v14 = vadd.f32 %v434_v11, %v1436_v10 }
 0x16d   : > { %v437_v13 = vadd.f32 %v436_v12, %v1434_v9 }
 0x16f   : > { %1003 = vtanh.f32 %v437_v13  ;;  %v440_v15 = vpop.f32.mrb[2].mxu0 }
 0x170   : > { %v442_v16 = vpop.f32.mrb[3].mxu0  ;;  %1005 = vtanh.f32 %v435_v14  ;;  %v441_v18 = vadd.f32 %v440_v15, %v1436_v10 }
 0x171   : > { %v443_v17 = vadd.f32 %v442_v16, %v1434_v9 }
 0x173   : > { %1007 = vtanh.f32 %v443_v17  ;;  %v446_v19 = vpop.f32.mrb[4].mxu0 }
 0x174   : > { %v448_v20 = vpop.f32.mrb[5].mxu0  ;;  %1009 = vtanh.f32 %v441_v18  ;;  %v447_v22 = vadd.f32 %v446_v19, %v1436_v10 }
 0x175   : > { %v449_v21 = vadd.f32 %v448_v20, %v1434_v9 }
 0x177   : > { %1011 = vtanh.f32 %v449_v21  ;;  %v452_v23 = vpop.f32.mrb[6].mxu0 }
 0x178   : > { %v454_v24 = vpop.f32.mrb[7].mxu0  ;;  %1013 = vtanh.f32 %v447_v22  ;;  %v453_v28 = vadd.f32 %v452_v23, %v1436_v10 }
 0x179   : > { %v1004_v25 = vpop.eup %1003  ;;  %v455_v26 = vadd.f32 %v454_v24, %v1434_v9 }
 0x17a   : > { %v561_v27 = vmul.f32 0.5, %v1004_v25  ;;  %v1006_v30 = vpop.eup %1005 }
 0x17b   : > { %1015 = vtanh.f32 %v455_v26  ;;  %v458_v29 = vpop.f32.mrb[8].mxu0 }
 0x17c   : > { %v577_v31 = vadd.f32 0.5, %v561_v27  ;;  %v460_v32 = vpop.f32.mrb[9].mxu0  ;;  %1017 = vtanh.f32 %v453_v28  ;;  %v459_v36 = vadd.f32 %v458_v29, %v1436_v10 }
 0x17d   : > { %v1008_v33 = vpop.eup %1007  ;;  %v461_v34 = vadd.f32 %v460_v32, %v1434_v9 }
 0x17e   : > { %v562_v35 = vmul.f32 0.5, %v1008_v33  ;;  %v593_v37 = vmul.f32 %v1006_v30, %v577_v31  ;;  %v1010_v39 = vpop.eup %1009 }
 0x17f   : > { %1019 = vtanh.f32 %v461_v34  ;;  %v464_v38 = vpop.f32.mrb[10].mxu0 }
 0x180   : > { %v578_v40 = vadd.f32 0.5, %v562_v35  ;;  %v466_v41 = vpop.f32.mrb[11].mxu0  ;;  %1021 = vtanh.f32 %v459_v36  ;;  %v465_v45 = vadd.f32 %v464_v38, %v1436_v10 }
 0x181   : > { %v1012_v42 = vpop.eup %1011  ;;  %v467_v43 = vadd.f32 %v466_v41, %v1434_v9 }
 0x182   : > { %v563_v44 = vmul.f32 0.5, %v1012_v42  ;;  %v594_v46 = vmul.f32 %v1010_v39, %v578_v40  ;;  %v1014_v48 = vpop.eup %1013 }
 0x183   : > { %1023 = vtanh.f32 %v467_v43  ;;  %v470_v47 = vpop.f32.mrb[12].mxu0 }
 0x184   : > { %v579_v49 = vadd.f32 0.5, %v563_v44  ;;  %v472_v50 = vpop.f32.mrb[13].mxu0  ;;  %v916_v51 = vpack.c.bf16 %v594_v46, %v593_v37  ;;  %1025 = vtanh.f32 %v465_v45  ;;  %v471_v55 = vadd.f32 %v470_v47, %v1436_v10 }
 0x185   : > { %v1016_v52 = vpop.eup %1015  ;;  %v473_v53 = vadd.f32 %v472_v50, %v1434_v9 }
 0x186   : > { %v564_v54 = vmul.f32 0.5, %v1016_v52  ;;  %917 = vmatpush3.bf16.xpose.msra.mxu1 %v916_v51  ;;  %v595_v56 = vmul.f32 %v1014_v48, %v579_v49  ;;  %v1018_v58 = vpop.eup %1017 }
 0x187   : > { %1027 = vtanh.f32 %v473_v53  ;;  %v476_v57 = vpop.f32.mrb[14].mxu0  ;;  %918 = vmatprep.subr.bf16.mxu1 %v1201_v0 }
 0x188   : > { %v580_v59 = vadd.f32 0.5, %v564_v54  ;;  %v478_v60 = vpop.f32.mrb[15].mxu0  ;;  %1029 = vtanh.f32 %v471_v55  ;;  %v477_v1 = vadd.f32 %v476_v57, %v1436_v10 }
 0x189   : > { %v1020_v61 = vpop.eup %1019  ;;  %v479_v62 = vadd.f32 %v478_v60, %v1434_v9 }
 0x18a   : > { %v565_v63 = vmul.f32 0.5, %v1020_v61  ;;  %v596_v2 = vmul.f32 %v1018_v58, %v580_v59  ;;  %v1022_v4 = vpop.eup %1021 }
 0x18b   : > { %1031 = vtanh.f32 %v479_v62  ;;  %v482_v3 = vpop.f32.mrb[16].mxu0 }
 0x18c   : > { %v581_v5 = vadd.f32 0.5, %v565_v63  ;;  %v484_v6 = vpop.f32.mrb[17].mxu0  ;;  %v919_v7 = vpack.c.bf16 %v596_v2, %v595_v56  ;;  %1033 = vtanh.f32 %v477_v1  ;;  %v483_v13 = vadd.f32 %v482_v3, %v1436_v10 }
 0x18d   : > { %v1024_v8 = vpop.eup %1023  ;;  %v485_v11 = vadd.f32 %v484_v6, %v1434_v9 }
 0x18e   : > { %v566_v12 = vmul.f32 0.5, %v1024_v8  ;;  %920 = vmatpush3.bf16.xpose.msra.mxu1 %v919_v7  ;;  %v597_v14 = vmul.f32 %v1022_v4, %v581_v5  ;;  %v1026_v16 = vpop.eup %1025 }
 0x18f   : > { %1035 = vtanh.f32 %v485_v11  ;;  %v488_v15 = vpop.f32.mrb[18].mxu0  ;;  %921 = vmatprep.subr.bf16.mxu1 %v1201_v0 }
 0x190   : > { %v582_v17 = vadd.f32 0.5, %v566_v12  ;;  %v490_v18 = vpop.f32.mrb[19].mxu0  ;;  %1037 = vtanh.f32 %v483_v13  ;;  %v489_v22 = vadd.f32 %v488_v15, %v1436_v10 }
 0x191   : > { %v1028_v19 = vpop.eup %1027  ;;  %v491_v20 = vadd.f32 %v490_v18, %v1434_v9 }
 0x192   : > { %v567_v21 = vmul.f32 0.5, %v1028_v19  ;;  %v598_v23 = vmul.f32 %v1026_v16, %v582_v17  ;;  %v1030_v25 = vpop.eup %1029 }
 0x193   : > { %1039 = vtanh.f32 %v491_v20  ;;  %v494_v24 = vpop.f32.mrb[20].mxu0 }
 0x194   : > { %v583_v26 = vadd.f32 0.5, %v567_v21  ;;  %v496_v27 = vpop.f32.mrb[21].mxu0  ;;  %v922_v28 = vpack.c.bf16 %v598_v23, %v597_v14  ;;  %1041 = vtanh.f32 %v489_v22  ;;  %v495_v32 = vadd.f32 %v494_v24, %v1436_v10 }
 0x195   : > { %v1032_v29 = vpop.eup %1031  ;;  %v497_v30 = vadd.f32 %v496_v27, %v1434_v9 }
 0x196   : > { %v568_v31 = vmul.f32 0.5, %v1032_v29  ;;  %923 = vmatpush3.bf16.xpose.msra.mxu1 %v922_v28  ;;  %v599_v33 = vmul.f32 %v1030_v25, %v583_v26  ;;  %v1034_v35 = vpop.eup %1033 }
 0x197   : > { %1043 = vtanh.f32 %v497_v30  ;;  %v500_v34 = vpop.f32.mrb[22].mxu0  ;;  %924 = vmatprep.subr.bf16.mxu1 %v1201_v0 }
 0x198   : > { %v584_v36 = vadd.f32 0.5, %v568_v31  ;;  %v502_v37 = vpop.f32.mrb[23].mxu0  ;;  %1045 = vtanh.f32 %v495_v32  ;;  %v501_v41 = vadd.f32 %v500_v34, %v1436_v10 }
 0x199   : > { %v1036_v38 = vpop.eup %1035  ;;  %v503_v39 = vadd.f32 %v502_v37, %v1434_v9 }
 0x19a   : > { %v569_v40 = vmul.f32 0.5, %v1036_v38  ;;  %v600_v42 = vmul.f32 %v1034_v35, %v584_v36  ;;  %v1038_v44 = vpop.eup %1037 }
 0x19b   : > { %1047 = vtanh.f32 %v503_v39  ;;  %v506_v43 = vpop.f32.mrb[24].mxu0  ;;  %v609_v39 = vld [vmem:[%s1532_s3] sm:$0xff] }
 0x19c   : > { %v585_v45 = vadd.f32 0.5, %v569_v40  ;;  %v508_v46 = vpop.f32.mrb[25].mxu0  ;;  %v925_v47 = vpack.c.bf16 %v600_v42, %v599_v33  ;;  %1049 = vtanh.f32 %v501_v41  ;;  %v507_v51 = vadd.f32 %v506_v43, %v1436_v10  ;;  %v614_v40 = vpop.permute.xlu0 %613 }
 0x19d   : > { %v1040_v48 = vpop.eup %1039  ;;  %v509_v49 = vadd.f32 %v508_v46, %v1434_v9 }
 0x19e   : > { %v570_v50 = vmul.f32 0.5, %v1040_v48  ;;  %926 = vmatpush3.bf16.xpose.msra.mxu1 %v925_v47  ;;  %v601_v52 = vmul.f32 %v1038_v44, %v585_v45  ;;  %v1042_v54 = vpop.eup %1041 }
 0x19f   : > { %1051 = vtanh.f32 %v509_v49  ;;  %v512_v53 = vpop.f32.mrb[26].mxu0  ;;  %927 = vmatprep.subr.bf16.mxu1 %v1201_v0 }
 0x1a0   : > { %v586_v55 = vadd.f32 0.5, %v570_v50  ;;  %v514_v56 = vpop.f32.mrb[27].mxu0  ;;  %1053 = vtanh.f32 %v507_v51  ;;  %v513_v60 = vadd.f32 %v512_v53, %v1436_v10 }
 0x1a1   : > { %v1044_v57 = vpop.eup %1043  ;;  %v515_v58 = vadd.f32 %v514_v56, %v1434_v9 }
 0x1a2   : > { %v571_v59 = vmul.f32 0.5, %v1044_v57  ;;  %v602_v61 = vmul.f32 %v1042_v54, %v586_v55  ;;  %v1046_v63 = vpop.eup %1045 }
 0x1a3   : > { %1055 = vtanh.f32 %v515_v58  ;;  %v518_v62 = vpop.f32.mrb[28].mxu0 }
 0x1a4   : > { %v587_v1 = vadd.f32 0.5, %v571_v59  ;;  %v520_v2 = vpop.f32.mrb[29].mxu0  ;;  %v928_v3 = vpack.c.bf16 %v602_v61, %v601_v52  ;;  %1057 = vtanh.f32 %v513_v60  ;;  %v519_v7 = vadd.f32 %v518_v62, %v1436_v10 }
 0x1a5   : > { %v1048_v4 = vpop.eup %1047  ;;  %v521_v5 = vadd.f32 %v520_v2, %v1434_v9 }
 0x1a6   : > { %v572_v6 = vmul.f32 0.5, %v1048_v4  ;;  %929 = vmatpush3.bf16.xpose.msra.mxu1 %v928_v3  ;;  %v603_v8 = vmul.f32 %v1046_v63, %v587_v1  ;;  %v1050_v12 = vpop.eup %1049 }
 0x1a7   : > { %1059 = vtanh.f32 %v521_v5  ;;  %v524_v11 = vpop.f32.mrb[30].mxu0  ;;  %930 = vmatprep.subr.bf16.mxu1 %v1201_v0 }
 0x1a8   : > { %v588_v13 = vadd.f32 0.5, %v572_v6  ;;  %v526_v14 = vpop.f32.mrb[31].mxu0  ;;  %1061 = vtanh.f32 %v519_v7  ;;  %v525_v19 = vadd.f32 %v524_v11, %v1436_v10 }
 0x1a9   : > { %v1052_v15 = vpop.eup %1051  ;;  %v527_v16 = vadd.f32 %v526_v14, %v1434_v9 }
 0x1aa   : > { %v573_v17 = vmul.f32 0.5, %v1052_v15  ;;  %v604_v18 = vmul.f32 %v1050_v12, %v588_v13  ;;  %v1054_v20 = vpop.eup %1053 }
 0x1ab   : > { %1063 = vtanh.f32 %v527_v16 }
 0x1ac   : > { %v589_v21 = vadd.f32 0.5, %v573_v17  ;;  %v931_v22 = vpack.c.bf16 %v604_v18, %v603_v8  ;;  %1065 = vtanh.f32 %v525_v19 }
 0x1ad   : > { %v1056_v23 = vpop.eup %1055 }
 0x1ae   : > { %v574_v24 = vmul.f32 0.5, %v1056_v23  ;;  %932 = vmatpush3.bf16.xpose.msra.mxu1 %v931_v22  ;;  %v605_v25 = vmul.f32 %v1054_v20, %v589_v21  ;;  %v1058_v26 = vpop.eup %1057 }
 0x1af   : > { %933 = vmatprep.subr.bf16.mxu1 %v1201_v0 }
 0x1b0   : > { %v590_v27 = vadd.f32 0.5, %v574_v24 }
 0x1b1   : > { %v1060_v28 = vpop.eup %1059 }
 0x1b2   : > { %v575_v9 = vmul.f32 0.5, %v1060_v28  ;;  %v606_v29 = vmul.f32 %v1058_v26, %v590_v27  ;;  %v1062_v30 = vpop.eup %1061 }
 0x1b4   : > { %v591_v31 = vadd.f32 0.5, %v575_v9  ;;  %v934_v10 = vpack.c.bf16 %v606_v29, %v605_v25 }
 0x1b5   : > { %v1064_v32 = vpop.eup %1063 }
 0x1b6   : > { %v576_v33 = vmul.f32 0.5, %v1064_v32  ;;  %935 = vmatpush3.bf16.xpose.msra.mxu1 %v934_v10  ;;  %v607_v34 = vmul.f32 %v1062_v30, %v591_v31  ;;  %v1066_v36 = vpop.eup %1065 }
 0x1b7   : > { %936 = vmatprep.subr.bf16.mxu1 %v1201_v0 }
 0x1b8   : > { %v592_v35 = vadd.f32 0.5, %v576_v33 }
 0x1ba   : > { %v608_v37 = vmul.f32 %v1066_v36, %v592_v35 }
 0x1bc   : > { %v937_v38 = vpack.c.bf16 %v608_v37, %v607_v34 }
 0x1be   : > { %938 = vmatpush3.bf16.xpose.msra.mxu1 %v937_v38 }
 0x1c5   : > { %849 = vmatmul.mubr.f32.vlgmr.msra.gmra.mrb[0].mxu1 %v609_v39 }
 0x298   : > { %v682_v41 = vpop.f32.mrb[0].mxu1 }
 0x299   : > { %v683_v42 = vadd.f32 %v682_v41, %v614_v40  ;;  %v850_v0 = vpop.f32.mrb[1].mxu1 }
 0x29b   : > { %686 = vst [vmem:[%s258_s29] sm:$0xff] %v683_v42 }
 0x29c   : > { %1138 = shalt.err (!%p1135_p7)
}
 0x29d   : > { %s1139_s23 = scalar_lea.hbm %s1485_s11, 128  ;;  %s1143_s14 = scalar_lea.hbm %s1534_s5, 256 }
 0x29e   : > { %p1140_p9 = scmp.ne.s32.totalorder %s1485_s11, %s1139_s23  ;;  %p1144_p5 = scmp.lt.u32.totalorder %s1485_s11, %s1534_s5 }
 0x29f   : > { %p1145_p11 = scmp.lt.u32.totalorder %s1143_s14, %s1139_s23  ;;  %p1147_p4 = scmp.lt.u32.totalorder %s1139_s23, %s1485_s11 }
 0x2a0   : > { %p1141_p1 = pnand %p1140_p9, %p1330_p12 }
 0x2a1   : > { %p1146_p2 = por %p1145_p11, %p1144_p5 }
 0x2a2   : > { %p1142_p0 = pneg %p1141_p1 }
 0x2a3   : > { %p1148_p6 = por %p1147_p4, %p1146_p2 }
 0x2a5   : > { %p1149_p8 = pnand %p1148_p6, %p1142_p0 }
 0x2a7   : > { %1152 = shalt.err (!%p1149_p8)
}
 0x2a8   : > { %945 = dma.vmem_to_hbm [thread:$0]  (%p1330_p12), %s1487_s28, 128, %s1485_s11, %s688_s12  }
 0x2a9 PF: > { %s713_s15 = sand.u32 1, %s1183_s18   ;;  %p1549_p10 = scmp.ne.s32.totalorder %s1539_s25, 0 }
 0x2aa   : > { %p1550_p13 = scmp.ge.s32.totalorder %s1195_s21, 2  ;;  %s714_s29 = scalar_lea.sflag [#allocation4], %s713_s15 }
 0x2ac   : > { %p956_p3 = pnand %p1550_p13, %p1549_p10 }
 0x2ae   : > { %1178 = dma.done.wait (!%p956_p3), %s714_s29, 128  }
 0x2af   : > { %1180 = vsyncadd (!%p956_p3), %s714_s29, 4294967168  ;;  %p19_p7 = scmp.ge.s32.totalorder %s1292_s30, 4   ;;  %s1551_s18 = smov %s1187_s19 }
 0x2b0   : > { %s1552_s19 = smov %s1191_s20  ;;  %s1553_s20 = smov %s1326_s8 }
 0x2b1   : > { %s1554_s21 = smov %s1292_s30  ;;  %21 = sbr.rel (!%p19_p7) target bundleno = 6 (0x6), region = 89 }
 0x2b8   :  { %719 = vsyncpa [#allocation3], 1 }
 0x2b9   :  { %721 = vsyncpa [#allocation3 + $0x1], 1 }
 0x2ba   :  { %722 = vsyncpa [#allocation6], 1 }
 0x2bb   :  { %723 = vsyncpa [#allocation4], 1 }
 0x2bc   :  { %725 = vsyncpa [#allocation4 + $0x1], 1 }

</bundles_post_ra>
